<compile_context>
chip_gen: v7x
topology: tpu7x:2x2x1
jax: 0.10.0
libtpu: 0.0.40
codegen_flags: <defaults>
</compile_context>

<pallas_src>
import jax
import jax.numpy as jnp
from jax.experimental import pallas as pl
from jax.experimental.pallas import tpu as pltpu

EPS = 1e-5  # matches LayerNormalization(eps=1e-05)


def _layernorm_rows_kernel(alpha_ref, bias_ref, x_ref, o_ref):
    """alpha_ref, bias_ref: (1,) SMEM scalars; x_ref/o_ref: (TS, D) VMEM row tiles."""
    x = x_ref[...].astype(jnp.float32)
    d = x.shape[-1]
    mean = jnp.mean(x, axis=-1, keepdims=True)
    centered = x - mean
    # torch.std(dim=-1) default: *unbiased* estimator (divide by N-1); eps is added
    # to the standard deviation (NOT the variance) to match the reference module.
    var = jnp.sum(centered * centered, axis=-1, keepdims=True) * (1.0 / (d - 1))
    std = jnp.sqrt(var)
    # One reciprocal per row (shape (TS, 1)) instead of a divide per element.
    # approx=False keeps the result within the 1e-5 tolerance of the reference.
    inv = pl.reciprocal(std + EPS, approx=False)
    scale = alpha_ref[0] * inv          # fused per-row scale: alpha / (std + eps)
    shift = bias_ref[0]
    o_ref[...] = (centered * scale + shift).astype(o_ref.dtype)


def _pick_tile_rows(rows, d, itemsize):
    """Pick a row-tile size: multiple of the sublane count, ~2 MiB per tile."""
    sublane = 8 if itemsize >= 4 else 16          # f32 -> 8, bf16 -> 16
    row_bytes = d * itemsize
    target_bytes = 2 * 1024 * 1024                # ~2 MiB tile -> ~8 MiB w/ dbl-buffered in+out
    ts = max(sublane, (target_bytes // row_bytes) // sublane * sublane)
    ts = min(ts, 2048)
    rows_padded_min = ((rows + sublane - 1) // sublane) * sublane
    ts = min(ts, rows_padded_min)
    return ts


def layernorm_pallas(x, alpha, bias):
    """LayerNormalization over the last axis of x (any leading shape)."""
    orig_shape = x.shape
    d = orig_shape[-1]
    rows = 1
    for s in orig_shape[:-1]:
        rows *= s
    x2 = x.reshape(rows, d)

    itemsize = jnp.dtype(x.dtype).itemsize
    ts = _pick_tile_rows(rows, d, itemsize)
    num_blocks = pl.cdiv(rows, ts)
    rows_padded = num_blocks * ts
    if rows_padded != rows:
        # Pad with zero rows so every block is full; padded rows are normalized to
        # zero (0 / (0 + eps)) and sliced off afterwards — no NaNs, no effect.
        x2 = jnp.pad(x2, ((0, rows_padded - rows), (0, 0)))

    alpha = alpha.reshape((1,)).astype(jnp.float32)
    bias = bias.reshape((1,)).astype(jnp.float32)

    bytes_accessed = 2 * rows_padded * d * itemsize   # read x + write out
    cost = pl.CostEstimate(
        flops=7 * rows_padded * d,
        transcendentals=2 * rows_padded,              # sqrt + reciprocal per row
        bytes_accessed=bytes_accessed,
    )

    out = pl.pallas_call(
        _layernorm_rows_kernel,
        out_shape=jax.ShapeDtypeStruct((rows_padded, d), x.dtype),
        grid=(num_blocks,),
        in_specs=[
            pl.BlockSpec(memory_space=pltpu.MemorySpace.SMEM),   # alpha (scalar)
            pl.BlockSpec(memory_space=pltpu.MemorySpace.SMEM),   # bias  (scalar)
            pl.BlockSpec((ts, d), lambda i: (i, 0)),             # x row block
        ],
        out_specs=pl.BlockSpec((ts, d), lambda i: (i, 0)),
        compiler_params=pltpu.CompilerParams(
            dimension_semantics=("parallel",),
            vmem_limit_bytes=32 * 1024 * 1024,
        ),
        cost_estimate=cost,
    )(alpha, bias, x2)

    if rows_padded != rows:
        out = out[:rows]
    return out.reshape(orig_shape)


def encoder_forward(x, src_mask, layers, alpha, bias):
    """Mirrors Encoder.forward: apply each layer, then LayerNormalization (Pallas).

    x:        (B, S, D) activations
    src_mask: attention mask, threaded through the layers (unused by the norm)
    layers:   sequence of JAX callables f(x, src_mask) -> x
    alpha:    (1,) float32 scale parameter
    bias:     (1,) float32 shift parameter
    """
    # TODO(synk): the nn.ModuleList layer internals (attention / FFN blocks) are not
    # defined in the reference module; they are applied here as caller-provided
    # callables rather than being re-implemented speculatively.
    for layer in layers:
        x = layer(x, src_mask)
    return layernorm_pallas(x, alpha, bias)


def _reference_encoder(x, src_mask, layers, alpha, bias):
    """Pure-JAX reference matching the PyTorch forward semantics."""
    for layer in layers:
        x = layer(x, src_mask)
    mean = jnp.mean(x, axis=-1, keepdims=True)
    # ddof=1 -> torch.std unbiased default
    std = jnp.std(x, axis=-1, keepdims=True, ddof=1)
    return alpha[0] * (x - mean) / (std + EPS) + bias[0]


if __name__ == "__main__":
    key = jax.random.PRNGKey(0)
    B, S, D = 2, 8, 128
    kx, _ = jax.random.split(key)
    x = jax.random.normal(kx, (B, S, D), dtype=jnp.float32)
    # Standard (B, 1, S, S) source mask shape for a transformer encoder.
    src_mask = jnp.ones((B, 1, S, S), dtype=jnp.float32)

    # Deterministic parameter init per LayerNormalization.__init__:
    alpha = jnp.ones((1,), dtype=jnp.float32)   # nn.Parameter(torch.ones(1))
    bias = jnp.zeros((1,), dtype=jnp.float32)   # nn.Parameter(torch.zeros(1))

    layers = []  # no EncoderBlock definitions provided in the reference module

    out = encoder_forward(x, src_mask, layers, alpha, bias)
    out = jax.block_until_ready(out)

    ref = _reference_encoder(x, src_mask, layers, alpha, bias)
    assert out.shape == (B, S, D)
    assert jnp.allclose(out, ref, atol=1e-5, rtol=1e-5)

    print("KERNEL_OK")
</pallas_src>

<mosaic_0001>
module attributes {stable_mosaic.version = 11 : i64} {
  func.func @_layernorm_rows_kernel(%arg0: i32, %arg1: memref<1xf32, #tpu.memory_space<smem>>, %arg2: memref<1xf32, #tpu.memory_space<smem>>, %arg3: memref<16x128xf32, #tpu.memory_space<vmem>>, %arg4: memref<16x128xf32, #tpu.memory_space<vmem>>) attributes {dimension_semantics = [#tpu.dimension_semantics<parallel>], iteration_bounds = array<i64: 1>, scalar_prefetch = 0 : i64, scratch_operands = 0 : i64, tpu.core_type = #tpu.core_type<tc>, window_params = [{transform_indices = @transform_0, window_bounds = array<i64: 1>}, {transform_indices = @transform_1, window_bounds = array<i64: 1>}, {transform_indices = @transform_2, window_bounds = array<i64: 16, 128>}, {transform_indices = @transform_3, window_bounds = array<i64: 16, 128>}]} {
    %c0 = arith.constant 0 : index
    %c0_0 = arith.constant 0 : index
    %0 = vector.load %arg3[%c0, %c0_0] : memref<16x128xf32, #tpu.memory_space<vmem>>, vector<16x128xf32>
    %cst = arith.constant dense<0.000000e+00> : vector<16xf32>
    %1 = vector.multi_reduction <add>, %0, %cst [1] : vector<16x128xf32> to vector<16xf32>
    %2 = vector.shape_cast %1 : vector<16xf32> to vector<16x1xf32>
    %cst_1 = arith.constant 1.280000e+02 : f32
    %3 = vector.broadcast %cst_1 : f32 to vector<16x1xf32>
    %4 = arith.divf %2, %3 : vector<16x1xf32>
    %5 = vector.broadcast %4 : vector<16x1xf32> to vector<16x128xf32>
    %6 = arith.subf %0, %5 : vector<16x128xf32>
    %7 = arith.mulf %6, %6 : vector<16x128xf32>
    %cst_2 = arith.constant dense<0.000000e+00> : vector<16xf32>
    %8 = vector.multi_reduction <add>, %7, %cst_2 [1] : vector<16x128xf32> to vector<16xf32>
    %9 = vector.shape_cast %8 : vector<16xf32> to vector<16x1xf32>
    %cst_3 = arith.constant 0.00787401571 : f32
    %10 = vector.broadcast %cst_3 : f32 to vector<16x1xf32>
    %11 = arith.mulf %9, %10 : vector<16x1xf32>
    %12 = math.sqrt %11 : vector<16x1xf32>
    %cst_4 = arith.constant 9.99999974E-6 : f32
    %13 = vector.broadcast %cst_4 : f32 to vector<16x1xf32>
    %14 = arith.addf %12, %13 : vector<16x1xf32>
    %15 = tpu.reciprocal %14 : vector<16x1xf32> -> vector<16x1xf32>
    %c0_5 = arith.constant 0 : index
    %16 = memref.load %arg1[%c0_5] : memref<1xf32, #tpu.memory_space<smem>>
    %17 = vector.broadcast %16 : f32 to vector<16x1xf32>
    %18 = arith.mulf %17, %15 : vector<16x1xf32>
    %c0_6 = arith.constant 0 : index
    %19 = memref.load %arg2[%c0_6] : memref<1xf32, #tpu.memory_space<smem>>
    %20 = vector.broadcast %18 : vector<16x1xf32> to vector<16x128xf32>
    %21 = arith.mulf %6, %20 : vector<16x128xf32>
    %22 = vector.broadcast %19 : f32 to vector<16x128xf32>
    %23 = arith.addf %21, %22 : vector<16x128xf32>
    %c0_7 = arith.constant 0 : index
    %c0_8 = arith.constant 0 : index
    %24 = vector.load %arg4[%c0_7, %c0_8] : memref<16x128xf32, #tpu.memory_space<vmem>>, vector<16x128xf32>
    tpu.vector_store %arg4[%c0_7, %c0_8], %23 {strides = array<i32>} : memref<16x128xf32, #tpu.memory_space<vmem>>, vector<16x128xf32>,
    return
  }
  func.func @transform_0(%arg0: i32) -> i32 {
    %c0_i32 = arith.constant 0 : i32
    %c0_i32_0 = arith.constant 0 : i32
    return %c0_i32 : i32
  }
  func.func @transform_1(%arg0: i32) -> i32 {
    %c0_i32 = arith.constant 0 : i32
    %c0_i32_0 = arith.constant 0 : i32
    return %c0_i32 : i32
  }
  func.func @transform_2(%arg0: i32) -> (i32, i32) {
    %c0_i32 = arith.constant 0 : i32
    %c0_i32_0 = arith.constant 0 : i32
    return %arg0, %c0_i32 : i32, i32
  }
  func.func @transform_3(%arg0: i32) -> (i32, i32) {
    %c0_i32 = arith.constant 0 : i32
    %c0_i32_0 = arith.constant 0 : i32
    return %arg0, %c0_i32 : i32, i32
  }
}

</mosaic_0001>

<bundles_post_ra>
// kernel: tpu_custom_call.1
= control target key start
LH: loop header
LB: loop body
LE: loop exit
PB: predicated region body
PF: predicated region fallthrough
CT: control target
= control target key end

     0   :  { %10 = vsyncpa [#allocation5], 0  ;;  %s217_s0 = inlined_call_operand.<no memory space> [shape: f32[1], index: 0, kind: input, shape index: {}]   ;;  %s218_s1 = inlined_call_operand.<no memory space> [shape: f32[1], index: 1, kind: input, shape index: {}]   ;;  %s219_s2 = inlined_call_operand.hbm [shape: f32[16,128], index: 2, kind: input, shape index: {}]   ;;  %s220_s3 = inlined_call_operand.hbm [shape: f32[16,128], index: 3, kind: output, shape index: {}]  }
   0x1   :  { %11 = vsyncpa [#allocation6], 0  ;;  %s157_s12 = smov [#allocation4]   ;;  %s109_s16 = scalar_lea.hbm %s219_s2, 256 }
   0x2   :  { %s21_s13 = sshll.u32 %s157_s12, 4  ;;  %p110_p0 = scmp.ne.s32.totalorder %s219_s2, %s109_s16  ;;  %s22_s13 = int_to_ptr.vmem [resolvable:$true] %s21_s13 }
   0x3   :  { %p113_p1 = scmp.lt.u32.totalorder %s109_s16, %s219_s2 }
   0x5   :  { %p115_p2 = pnand %p113_p1, %p110_p0 }
   0x7   :  { %118 = shalt.err (!%p115_p2)
}
   0x8   :  { %s119_s21 = scalar_lea.vmem %s22_s13, 256  ;;  %p124_p4 = scmp.lt.s32.totalorder %s22_s13, %s22_s13 }
   0x9   :  { %p120_p3 = scmp.ne.s32.totalorder %s22_s13, %s119_s21  ;;  %p125_p5 = scmp.lt.s32.totalorder %s119_s21, %s119_s21 }
   0xb   :  { %p126_p6 = por %p125_p5, %p124_p4 }
   0xd   :  { %p127_p7 = pnand %p126_p6, %p120_p3 }
   0xf   :  { %130 = shalt.err (!%p127_p7)
}
  0x10   :  { %s158_s22 = smov 128   ;;  %s159_s23 = smov 8  }
  0x11   :  { %27 = dma.hbm_to_vmem [thread:$0]  %s219_s2, 256, %s22_s13, [#allocation5], %s158_s22, %s158_s22, %s159_s23  }
  0x12   :  { %153 = dma.done.wait [#allocation5], 256  }
  0x13   :  { %154 = vsyncadd [#allocation5], 4294967040  ;;  %v31_v0 = vld [vmem:[#allocation4] sm:$0xff]  ;;  %v32_v1 = vld [vmem:[#allocation4 + $0x8] sm:$0xff]  ;;  %v69_v26 = vstv %s217_s0  ;;  %v75_v29 = vstv %s218_s1  ;;  %s160_s29 = smov [#allocation7]  }
  0x14   :  { %33 = vadd.xlane.f32.xlu0 %v31_v0  ;;  %s85_s30 = sshll.u32 %s160_s29, 4  ;;  %s86_s30 = int_to_ptr.vmem [resolvable:$true] %s85_s30 }
  0x15   :  { %s131_s4 = scalar_lea.vmem %s86_s30, 256  ;;  %p136_p9 = scmp.lt.s32.totalorder %s86_s30, %s86_s30 }
  0x16   :  { %p132_p8 = scmp.ne.s32.totalorder %s86_s30, %s131_s4  ;;  %p137_p10 = scmp.lt.s32.totalorder %s131_s4, %s131_s4 }
  0x18   :  { %35 = vadd.xlane.f32.xlu0 %v32_v1  ;;  %p138_p11 = por %p137_p10, %p136_p9 }
  0x1a   :  { %p139_p12 = pnand %p138_p11, %p132_p8 }
  0xa1   :  { %v34_v2 = vpop.xlane.xlu0 %33 }
  0xa2   :  { %v38_v3 = vmul.f32 0.0078125, %v34_v2 }
  0xa4   :  { %v40_v4 = vsub.f32 %v31_v0, %v38_v3 }
  0xa5   :  { %v36_v5 = vpop.xlane.xlu0 %35 }
  0xa6   :  { %v39_v6 = vmul.f32 0.0078125, %v36_v5  ;;  %v42_v7 = vmul.f32 %v40_v4, %v40_v4 }
  0xa8   :  { %v41_v8 = vsub.f32 %v32_v1, %v39_v6  ;;  %44 = vadd.xlane.f32.xlu1 %v42_v7 }
  0xaa   :  { %v43_v9 = vmul.f32 %v41_v8, %v41_v8 }
  0xac   :  { %46 = vadd.xlane.f32.xlu1 %v43_v9 }
 0x135   :  { %v45_v10 = vpop.xlane.xlu1 %44 }
 0x136   :  { %v48_v11 = vmul.f32 0.007874016, %v45_v10 }
 0x138   :  { %101 = vrsqrt.f32 %v48_v11  ;;  %vm52_vm0 = vcmp.eq.f32.partialorder %v48_v11, inf  ;;  %v55_v16 = vand.u32 2147483648, %v48_v11  ;;  %vm54_vm1 = vcmp.eq.f32.partialorder %v48_v11, 0.0 }
 0x139   :  { %v47_v12 = vpop.xlane.xlu1 %46 }
 0x13a   :  { %v49_v13 = vmul.f32 0.007874016, %v47_v12 }
 0x13c   :  { %103 = vrsqrt.f32 %v49_v13  ;;  %vm59_vm2 = vcmp.eq.f32.partialorder %v49_v13, inf  ;;  %v62_v22 = vand.u32 2147483648, %v49_v13  ;;  %vm61_vm3 = vcmp.eq.f32.partialorder %v49_v13, 0.0 }
 0x142   :  { %v102_v14 = vpop.eup %101 }
 0x143   :  { %v51_v15 = vmul.f32 %v102_v14, %v48_v11 }
 0x145   :  { %v53_v17 = vsel %vm52_vm0, %v48_v11, %v51_v15 }
 0x146   :  { %v104_v18 = vpop.eup %103  ;;  %v56_v19 = vsel %vm54_vm1, %v55_v16, %v53_v17 }
 0x147   :  { %v58_v20 = vmul.f32 %v104_v18, %v49_v13  ;;  %v64_v21 = vadd.f32 1e-05, %v56_v19 }
 0x149   :  { %v60_v23 = vsel %vm59_vm2, %v49_v13, %v58_v20  ;;  %105 = vrcp.f32 %v64_v21 }
 0x14a   :  { %v63_v24 = vsel %vm61_vm3, %v62_v22, %v60_v23 }
 0x14b   :  { %v65_v25 = vadd.f32 1e-05, %v63_v24 }
 0x14d   :  { %107 = vrcp.f32 %v65_v25 }
 0x153   :  { %v106_v27 = vpop.eup %105 }
 0x154   :  { %v70_v28 = vmul.f32 %v106_v27, %v69_v26 }
 0x156   :  { %v73_v30 = vmul.f32 %v70_v28, %v40_v4 }
 0x157   :  { %v108_v31 = vpop.eup %107 }
 0x158   :  { %v71_v32 = vmul.f32 %v108_v31, %v69_v26  ;;  %v76_v33 = vadd.f32 %v75_v29, %v73_v30 }
 0x15a   :  { %v74_v34 = vmul.f32 %v71_v32, %v41_v8  ;;  %78 = vst [vmem:[#allocation7] sm:$0xff] %v76_v33 }
 0x15c   :  { %v77_v35 = vadd.f32 %v75_v29, %v74_v34 }
 0x15e   :  { %79 = vst [vmem:[#allocation7 + $0x8] sm:$0xff] %v77_v35 }
 0x15f   :  { %142 = shalt.err (!%p139_p12)
}
 0x160   :  { %s143_s5 = scalar_lea.hbm %s220_s3, 256 }
 0x161   :  { %p144_p13 = scmp.ne.s32.totalorder %s220_s3, %s143_s5  ;;  %p147_p0 = scmp.lt.u32.totalorder %s143_s5, %s220_s3 }
 0x163   :  { %p149_p1 = pnand %p147_p0, %p144_p13 }
 0x165   :  { %152 = shalt.err (!%p149_p1)
}
 0x166   :  { %91 = dma.vmem_to_hbm [thread:$0]  %s86_s30, 256, %s220_s3, [#allocation6], %s158_s22, %s158_s22, %s159_s23  }
 0x167   :  { %155 = dma.done.wait [#allocation6], 256  }
 0x168   :  { %156 = vsyncadd [#allocation6], 4294967040 }
 0x169   :  { %95 = vsyncpa [#allocation5], 1 }
 0x16a   :  { %96 = vsyncpa [#allocation6], 1 }

</bundles_post_ra>
